<compile_context>
chip_gen: v6e
topology: v6e:2x2x1
jax: 0.10.0
libtpu: 0.0.40
codegen_flags: <defaults>
</compile_context>

<pallas_src>
import jax
import jax.numpy as jnp
from jax import lax
from jax.experimental import pallas as pl
from jax.experimental.pallas import tpu as pltpu


def simplenet_kernel(x_ref, w1_ref, b1_ref, w2_ref, b2_ref, o_ref):
    # fc1: h^T = W1 @ x_blk^T -> (d_hid, tb). Native (tb, d_in) x tile; the MXU
    # takes the transposed RHS operand directly (contraction on dim 1 of both).
    h = lax.dot_general(
        w1_ref[...], x_ref[...],
        dimension_numbers=(((1,), (1,)), ((), ())),
        preferred_element_type=jnp.float32,
    )
    h = jnp.maximum(h + b1_ref[...], 0.0)                 # f32 bias + ReLU on the VPU
    # fc2 (d_hid -> 1): VPU multiply + sublane reduce (no 1-column MXU pass).
    y = jnp.sum(h * w2_ref[...], axis=0, keepdims=True)   # (1, tb), lane-dense
    o_ref[...] = (y + b2_ref[0, 0]).astype(o_ref.dtype)   # scalar fc2 bias from SMEM


def _choose_tb(B, max_tb=8192):
    """Batch tile: multiple of 256 (v6e/v7x MXU width), <= ceil(B/2) so the
    'parallel' batch axis keeps >= 2 grid steps (v7x megacore), capped at 8192
    (HBM/step-overhead bound kernel -> big tiles; VMEM cost is trivial)."""
    if B <= 256:
        return B                                  # single full-array block (legal)
    half = -(-B // 2)                             # ceil(B / 2)
    return min(max_tb, ((half + 255) // 256) * 256)


def simplenet_forward(x, w1, b1, w2, b2, *, tb=None):
    """x: (B, 10); w1 (20,10), b1 (20,), w2 (1,20), b2 (1,) in PyTorch layout.
    Returns (B, 1), matching SimpleNet.forward."""
    B, d_in = x.shape
    d_hid, _ = w1.shape

    if tb is None:
        tb = _choose_tb(B)
    g = pl.cdiv(B, tb)                            # last block OOB-masked if needed

    x = x.astype(jnp.float32)                     # native layout, no transpose/pad pass
    b1c = b1.reshape(d_hid, 1).astype(jnp.float32)   # column -> broadcast over lanes
    w2c = w2.reshape(d_hid, 1).astype(jnp.float32)   # column -> VPU mul + sublane reduce
    b2s = b2.reshape(1, 1).astype(jnp.float32)       # single scalar -> SMEM

    flops = 2 * B * d_in * d_hid + 2 * B * d_hid
    bytes_accessed = 4 * (x.size + w1.size + b1c.size + w2c.size + b2s.size + B)

    out = pl.pallas_call(
        simplenet_kernel,
        out_shape=jax.ShapeDtypeStruct((1, B), jnp.float32),
        grid=(g,),
        in_specs=[
            pl.BlockSpec((tb, d_in), lambda i: (i, 0)),         # x: native, contiguous tile
            pl.BlockSpec((d_hid, d_in), lambda i: (0, 0)),      # W1 resident
            pl.BlockSpec((d_hid, 1), lambda i: (0, 0)),         # b1 resident
            pl.BlockSpec((d_hid, 1), lambda i: (0, 0)),         # w2 resident
            pl.BlockSpec(memory_space=pltpu.MemorySpace.SMEM),  # b2 scalar in SMEM
        ],
        out_specs=pl.BlockSpec((1, tb), lambda i: (0, i)),      # lane-dense output
        compiler_params=pltpu.CompilerParams(
            dimension_semantics=("parallel",),
        ),
        cost_estimate=pl.CostEstimate(
            flops=flops, transcendentals=0, bytes_accessed=bytes_accessed),
    )(x, w1.astype(jnp.float32), b1c, w2c, b2s)

    return out.reshape(B, 1)


def _reference(x, w1, b1, w2, b2):
    return jnp.maximum(x @ w1.T + b1, 0.0) @ w2.T + b2


if __name__ == "__main__":
    key = jax.random.PRNGKey(0)
    k_x, k_w1, k_b1, k_w2, k_b2, k_x2 = jax.random.split(key, 6)

    B, D_IN, D_HID, D_OUT = 8, 10, 20, 1

    # Deterministic synthetic parameters in PyTorch nn.Linear layout.
    x = jax.random.normal(k_x, (B, D_IN), dtype=jnp.float32)
    w1 = jax.random.normal(k_w1, (D_HID, D_IN), dtype=jnp.float32) * 0.1   # fc1.weight
    b1 = jax.random.normal(k_b1, (D_HID,), dtype=jnp.float32) * 0.1        # fc1.bias
    w2 = jax.random.normal(k_w2, (D_OUT, D_HID), dtype=jnp.float32) * 0.1  # fc2.weight
    b2 = jax.random.normal(k_b2, (D_OUT,), dtype=jnp.float32) * 0.1        # fc2.bias

    out = jax.block_until_ready(simplenet_forward(x, w1, b1, w2, b2))
    ref = _reference(x, w1, b1, w2, b2)
    assert out.shape == (B, D_OUT)
    assert jnp.allclose(out, ref, atol=1e-5, rtol=1e-5)

    # Second check: real batch grid — tb=512, 2 "parallel" steps, resident
    # weights, and an OOB-masked final block (600 % 512 != 0).
    B2 = 600
    x2 = jax.random.normal(k_x2, (B2, D_IN), dtype=jnp.float32)
    out2 = jax.block_until_ready(simplenet_forward(x2, w1, b1, w2, b2))
    ref2 = _reference(x2, w1, b1, w2, b2)
    assert out2.shape == (B2, D_OUT)
    assert jnp.allclose(out2, ref2, atol=1e-5, rtol=1e-5)

    print("KERNEL_OK")
</pallas_src>

<mosaic_0001>
module attributes {stable_mosaic.version = 11 : i64} {
  func.func @simplenet_kernel(%arg0: i32, %arg1: memref<8x10xf32, #tpu.memory_space<vmem>>, %arg2: memref<20x10xf32, #tpu.memory_space<vmem>>, %arg3: memref<20x1xf32, #tpu.memory_space<vmem>>, %arg4: memref<20x1xf32, #tpu.memory_space<vmem>>, %arg5: memref<1x1xf32, #tpu.memory_space<smem>>, %arg6: memref<1x8xf32, #tpu.memory_space<vmem>>) attributes {dimension_semantics = [#tpu.dimension_semantics<parallel>], iteration_bounds = array<i64: 1>, scalar_prefetch = 0 : i64, scratch_operands = 0 : i64, tpu.core_type = #tpu.core_type<tc>, window_params = [{transform_indices = @transform_0, window_bounds = array<i64: 8, 10>}, {pipeline_mode = #tpu.pipeline_mode<synchronous>, transform_indices = @transform_1, window_bounds = array<i64: 20, 10>}, {pipeline_mode = #tpu.pipeline_mode<synchronous>, transform_indices = @transform_2, window_bounds = array<i64: 20, 1>}, {pipeline_mode = #tpu.pipeline_mode<synchronous>, transform_indices = @transform_3, window_bounds = array<i64: 20, 1>}, {transform_indices = @transform_4, window_bounds = array<i64: 1, 1>}, {transform_indices = @transform_5, window_bounds = array<i64: 1, 8>}]} {
    %c0 = arith.constant 0 : index
    %c0_0 = arith.constant 0 : index
    %0 = vector.load %arg2[%c0, %c0_0] : memref<20x10xf32, #tpu.memory_space<vmem>>, vector<20x10xf32>
    %c0_1 = arith.constant 0 : index
    %c0_2 = arith.constant 0 : index
    %1 = vector.load %arg1[%c0_1, %c0_2] : memref<8x10xf32, #tpu.memory_space<vmem>>, vector<8x10xf32>
    %cst = arith.constant dense<0.000000e+00> : vector<20x8xf32>
    %2 = tpu.matmul %0, %1, %cst {dimension_numbers = #tpu.dot_dimension_numbers<[1], [1], [0], [0], [0, 0, 1, 0], [], []>} : vector<20x10xf32>, vector<8x10xf32>, vector<20x8xf32> -> vector<20x8xf32>
    %c0_3 = arith.constant 0 : index
    %c0_4 = arith.constant 0 : index
    %3 = vector.load %arg3[%c0_3, %c0_4] : memref<20x1xf32, #tpu.memory_space<vmem>>, vector<20x1xf32>
    %4 = vector.broadcast %3 : vector<20x1xf32> to vector<20x8xf32>
    %5 = arith.addf %2, %4 : vector<20x8xf32>
    %cst_5 = arith.constant 0.000000e+00 : f32
    %6 = vector.broadcast %cst_5 : f32 to vector<20x8xf32>
    %7 = arith.maximumf %5, %6 : vector<20x8xf32>
    %c0_6 = arith.constant 0 : index
    %c0_7 = arith.constant 0 : index
    %8 = vector.load %arg4[%c0_6, %c0_7] : memref<20x1xf32, #tpu.memory_space<vmem>>, vector<20x1xf32>
    %9 = vector.broadcast %8 : vector<20x1xf32> to vector<20x8xf32>
    %10 = arith.mulf %7, %9 : vector<20x8xf32>
    %cst_8 = arith.constant dense<0.000000e+00> : vector<8xf32>
    %11 = vector.multi_reduction <add>, %10, %cst_8 [0] : vector<20x8xf32> to vector<8xf32>
    %12 = vector.shape_cast %11 : vector<8xf32> to vector<1x8xf32>
    %c0_9 = arith.constant 0 : index
    %c0_10 = arith.constant 0 : index
    %13 = memref.load %arg5[%c0_9, %c0_10] : memref<1x1xf32, #tpu.memory_space<smem>>
    %14 = vector.broadcast %13 : f32 to vector<1x8xf32>
    %15 = arith.addf %12, %14 : vector<1x8xf32>
    %c0_11 = arith.constant 0 : index
    %c0_12 = arith.constant 0 : index
    %16 = vector.load %arg6[%c0_11, %c0_12] : memref<1x8xf32, #tpu.memory_space<vmem>>, vector<1x8xf32>
    tpu.vector_store %arg6[%c0_11, %c0_12], %15 {strides = array<i32>} : memref<1x8xf32, #tpu.memory_space<vmem>>, vector<1x8xf32>,
    return
  }
  func.func @transform_0(%arg0: i32) -> (i32, i32) {
    %c0_i32 = arith.constant 0 : i32
    %c0_i32_0 = arith.constant 0 : i32
    return %arg0, %c0_i32 : i32, i32
  }
  func.func @transform_1(%arg0: i32) -> (i32, i32) {
    %c0_i32 = arith.constant 0 : i32
    %c0_i32_0 = arith.constant 0 : i32
    %c0_i32_1 = arith.constant 0 : i32
    return %c0_i32, %c0_i32_0 : i32, i32
  }
  func.func @transform_2(%arg0: i32) -> (i32, i32) {
    %c0_i32 = arith.constant 0 : i32
    %c0_i32_0 = arith.constant 0 : i32
    %c0_i32_1 = arith.constant 0 : i32
    return %c0_i32, %c0_i32_0 : i32, i32
  }
  func.func @transform_3(%arg0: i32) -> (i32, i32) {
    %c0_i32 = arith.constant 0 : i32
    %c0_i32_0 = arith.constant 0 : i32
    %c0_i32_1 = arith.constant 0 : i32
    return %c0_i32, %c0_i32_0 : i32, i32
  }
  func.func @transform_4(%arg0: i32) -> (i32, i32) {
    %c0_i32 = arith.constant 0 : i32
    %c0_i32_0 = arith.constant 0 : i32
    %c0_i32_1 = arith.constant 0 : i32
    return %c0_i32, %c0_i32_0 : i32, i32
  }
  func.func @transform_5(%arg0: i32) -> (i32, i32) {
    %c0_i32 = arith.constant 0 : i32
    %c0_i32_0 = arith.constant 0 : i32
    return %c0_i32, %arg0 : i32, i32
  }
}

</mosaic_0001>

<bundles_post_ra>
// kernel: tpu_custom_call.1
= control target key start
LH: loop header
LB: loop body
LE: loop exit
PB: predicated region body
PF: predicated region fallthrough
CT: control target
= control target key end

     0   :  { %vm44_vm0 = vcmask 80896   ;;  %v242_v1 = vmov 0.0   ;;  %vm243_vm1 = vmmov 0   ;;  %s317_s0 = inlined_call_operand.vmem [shape: f32[8,10], index: 0, kind: input, shape index: {}]   ;;  %s318_s1 = inlined_call_operand.vmem [shape: f32[20,10], index: 1, kind: input, shape index: {}]   ;;  %s319_s2 = inlined_call_operand.vmem [shape: f32[20,1], index: 2, kind: input, shape index: {}]   ;;  %s320_s3 = inlined_call_operand.vmem [shape: f32[20,1], index: 3, kind: input, shape index: {}]   ;;  %s321_s4 = inlined_call_operand.<no memory space> [shape: f32[1,1], index: 4, kind: input, shape index: {}]   ;;  %s322_s5 = inlined_call_operand.hbm [shape: f32[1,8], index: 5, kind: output, shape index: {}]  }
   0x1   :  { %v25_v0 = vld [vmem:[%s317_s0] sm:$0xff]  ;;  %201 = vmatprep.subr.mxu0 %v242_v1  ;;  %212 = vmatprep.subr.mxu1 %v242_v1  ;;  %v23_v3 = vld [vmem:[%s318_s1 + $0x8] sm:$0xff] }
   0x2   :  { %202 = vmatpush3.xpose.msk.msra.mxu0 %vm44_vm0, %v25_v0  ;;  %213 = vmatpush3.xpose.msk.msra.mxu1 %vm44_vm0, %v25_v0  ;;  %v22_v2 = vld [vmem:[%s318_s1] sm:$0xff] }
   0x3   :  { %203 = vmatprep.mubr.msk.f32.mxu0 %vm243_vm1, %v242_v1  ;;  %206 = vmatprep.mubr.msk.f32.mxu1 %vm243_vm1, %v242_v1  ;;  %v26_v4 = vld [vmem:[%s319_s2] sm:$0xff] }
   0x4   :  { %11 = vsyncpa [#allocation4], 0  ;;  %v244_v5 = vmov 0   ;;  %v28_v6 = vld [vmem:[%s319_s2 + $0x10] sm:$0xf]  ;;  %v27_v8 = vld [vmem:[%s319_s2 + $0x8] sm:$0xff]  ;;  %v175_v43 = vstv %s321_s4 }
   0x5   :  { %218 = vset.pattern.permute.xlu0 %v244_v5  ;;  %219 = vset.pattern.permute.xlu1 %v244_v5  ;;  %v24_v7 = vld [vmem:[%s318_s1 + $0x10] sm:$0xf]  ;;  %v140_v9 = vld [vmem:[%s320_s3] sm:$0xff]  ;;  %v141_v10 = vld [vmem:[%s320_s3 + $0x8] sm:$0xff]  ;;  %vm161_vm2 = vcmask 64512   ;;  %vm165_vm3 = vcmask 60416  }
   0x6   :  { %204 = vmatmul.mubr.msk.f32.vlgmr.msra.gmra.mxu0 %vm44_vm0, %v22_v2  ;;  %207 = vmatmul.mubr.msk.f32.vlgmr.msra.gmra.mxu1 %vm44_vm0, %v23_v3  ;;  %v142_v11 = vld [vmem:[%s320_s3 + $0x10] sm:$0xf]  ;;  %s245_s11 = smov [#allocation3]   ;;  %vm177_vm4 = vcmask 57344  }
   0x7   :  { %209 = vmatprep.mubr.msk.f32.mxu1 %vm243_vm1, %v242_v1  ;;  %31 = vperm.xlu0 %218, %v26_v4   ;;  %s185_s12 = sshll.u32 %s245_s11, 4  ;;  %s186_s12 = int_to_ptr.vmem [resolvable:$true] %s185_s12 }
   0x8   :  { %41 = vperm.xlu1 %219, %v28_v6   ;;  %s220_s13 = scalar_lea.vmem %s186_s12, 16  ;;  %s224_s14 = scalar_lea.vmem %s186_s12, 32 }
   0x9   :  { %p221_p0 = scmp.ne.s32.totalorder %s186_s12, %s220_s13  ;;  %p225_p1 = scmp.lt.s32.totalorder %s186_s12, %s186_s12 }
   0xa   :  { %210 = vmatmul.mubr.msk.f32.gmra.mxu1 %vm44_vm0, %v24_v7  ;;  %p226_p2 = scmp.lt.s32.totalorder %s224_s14, %s220_s13 }
   0xb   :  { %36 = vperm.xlu0 %218, %v27_v8  }
   0xc   :  { %145 = vperm.xlu1 %219, %v140_v9   ;;  %p227_p3 = por %p226_p2, %p225_p1 }
   0xe   :  { %p228_p4 = pnand %p227_p3, %p221_p0 }
   0xf   :  { %150 = vperm.xlu0 %218, %v141_v10  }
  0x10   :  { %155 = vperm.xlu1 %219, %v142_v11  }
  0x82   :  { %v32_v12 = vpop.permute.xlu0 %31 }
  0x83   :  { %v42_v13 = vpop.permute.xlu1 %41 }
  0x86   :  { %v37_v14 = vpop.permute.xlu0 %36 }
  0x87   :  { %v146_v17 = vpop.permute.xlu1 %145 }
  0x8a   :  { %v151_v24 = vpop.permute.xlu0 %150 }
  0x8b   :  { %v156_v33 = vpop.permute.xlu1 %155 }
  0xc6   :  { %v123_v15 = vpop.f32.mrf.mxu0  ;;  %v128_v16 = vpop.f32.mrf.mxu1 }
  0xc7   :  { %v124_v18 = vadd.f32 %v123_v15, %v32_v12  ;;  %v129_v19 = vadd.f32 %v128_v16, %v37_v14 }
  0xc8   :  { %v205_v20 = vpop.f32.mrf.mxu0  ;;  %v208_v21 = vpop.f32.mrf.mxu1 }
  0xc9   :  { %v137_v22 = vmax.f32 %v124_v18, 0.0  ;;  %v138_v23 = vmax.f32 %v129_v19, 0.0 }
  0xca   :  { %v133_v25 = vpop.f32.mrf.mxu1 }
  0xcb   :  { %v158_v26 = vmul.f32 %v146_v17, %v137_v22  ;;  %v159_v27 = vmul.f32 %v151_v24, %v138_v23  ;;  %v134_v28 = vadd.f32 %v133_v25, %v42_v13 }
  0xcc   :  { %v211_v29 = vpop.f32.mrf.mxu1 }
  0xcd   :  { %v162_v30 = vsel %vm161_vm2, %v158_v26, 0.0  ;;  %v163_v31 = vsel %vm161_vm2, %v159_v27, 0.0  ;;  %v139_v32 = vmax.f32 %v134_v28, 0.0 }
  0xce   :  { %v164_v35 = vadd.f32 %v163_v31, %v162_v30 }
  0xcf   :  { %v160_v34 = vmul.f32 %v156_v33, %v139_v32 }
  0xd1   :  { %v166_v36 = vsel %vm165_vm3, %v160_v34, 0.0 }
  0xd2   :  { %v167_v37 = vadd.f32 %v166_v36, %v164_v35 }
  0xd4   :  { %v168_v38 = vrot.slane %v167_v37, 4 }
  0xd6   :  { %v169_v39 = vadd.f32 %v168_v38, %v167_v37 }
  0xd8   :  { %v170_v40 = vrot.slane %v169_v39, 2 }
  0xda   :  { %v171_v41 = vadd.f32 %v170_v40, %v169_v39 }
  0xdc   :  { %v172_v42 = vrot.slane %v171_v41, 1 }
  0xde   :  { %v173_v44 = vadd.f32 %v172_v42, %v171_v41 }
  0xe0   :  { %v176_v45 = vadd.f32 %v175_v43, %v173_v44 }
  0xe2   :  { %178 = vst.msk [vmem:[#allocation3] sm:$0x1] %vm177_vm4, %v176_v45 }
  0xe3   :  { %231 = shalt.err (!%p228_p4)
}
  0xe4   :  { %188 = dma.vmem_to_hbm [thread:$0]  %s186_s12, 16, %s322_s5, [#allocation4]  }
  0xe5   :  { %240 = dma.done.wait [#allocation4], 16  }
  0xe6   :  { %241 = vsyncadd [#allocation4], 4294967280 }
  0xe7   :  { %192 = vsyncpa [#allocation4], 1 }

</bundles_post_ra>
